<compile_context>
chip_gen: v5e
topology: v5e:2x2
jax: 0.10.0
libtpu: 0.0.40
codegen_flags: <defaults>
</compile_context>

<pallas_src>
import functools

import jax
import jax.numpy as jnp
from jax import lax
from jax.experimental import pallas as pl
from jax.experimental.pallas import tpu as pltpu


_VMEM_LIMIT = 48 * 1024 * 1024  # below v7x's 64 MiB physical VMEM


def _pick_tile(n, target):
    """Largest tile <= target that divides n and is a multiple of 8 (or n)."""
    if n <= target:
        return n
    for t in range(target, 0, -1):
        if n % t == 0 and t % 8 == 0:
            return t
    return n


# ----------------------- fused (tiled) linear projection ---------------------
def _matmul_bias_kernel(x_ref, w_ref, b_ref, o_ref):
    # Weight is pre-transposed to (Cin, Cout): plain x @ w, no in-kernel .T
    o_ref[...] = (
        jnp.dot(x_ref[...], w_ref[...], preferred_element_type=jnp.float32)
        + b_ref[...]
    ).astype(o_ref.dtype)


def linear_fused(x2d, w_t, b, *, tile_m=256):
    """x2d: (M, Cin), w_t: (Cin, Cout) pre-transposed, b: (Cout,) -> (M, Cout)."""
    M, Cin = x2d.shape
    Cout = w_t.shape[1]
    tm = _pick_tile(M, tile_m)
    b2d = b.reshape(1, Cout)
    return pl.pallas_call(
        _matmul_bias_kernel,
        out_shape=jax.ShapeDtypeStruct((M, Cout), x2d.dtype),
        grid=(M // tm,),
        in_specs=[
            pl.BlockSpec((tm, Cin), lambda i: (i, 0)),
            pl.BlockSpec((Cin, Cout), lambda i: (0, 0)),   # weight resident
            pl.BlockSpec((1, Cout), lambda i: (0, 0)),
        ],
        out_specs=pl.BlockSpec((tm, Cout), lambda i: (i, 0)),
        compiler_params=pltpu.CompilerParams(
            dimension_semantics=("parallel",),
            vmem_limit_bytes=_VMEM_LIMIT,
        ),
    )(x2d, w_t, b2d)


# ------------------------ flash-style attention core -------------------------
def _flash_kernel(q_ref, k_ref, v_ref, o_ref, m_sc, l_sc, acc_sc):
    ki = pl.program_id(3)

    @pl.when(ki == 0)
    def _():
        m_sc[...] = jnp.full_like(m_sc, -jnp.inf)
        l_sc[...] = jnp.zeros_like(l_sc)
        acc_sc[...] = jnp.zeros_like(acc_sc)

    q = q_ref[...][0, 0]   # (TQ, D), already scaled (scale folded into wq)
    k = k_ref[...][0, 0]   # (TK, D)
    v = v_ref[...][0, 0]   # (TK, D)

    # s = q @ k^T without materializing a transposed copy of k.
    s = lax.dot_general(q, k, (((1,), (1,)), ((), ())),
                        preferred_element_type=jnp.float32)    # (TQ, TK)

    m_prev = m_sc[...]                                          # (TQ, 1)
    m_new = jnp.maximum(m_prev, jnp.max(s, axis=-1, keepdims=True))
    alpha = jnp.exp(m_prev - m_new)
    p = jnp.exp(s - m_new)
    l_sc[...] = alpha * l_sc[...] + jnp.sum(p, axis=-1, keepdims=True)
    acc_sc[...] = alpha * acc_sc[...] + jnp.dot(
        p.astype(v.dtype), v, preferred_element_type=jnp.float32)
    m_sc[...] = m_new

    @pl.when(ki == pl.num_programs(3) - 1)
    def _():
        inv_l = pl.reciprocal(l_sc[...], approx=True)           # one EUP rcp
        out2d = (acc_sc[...] * inv_l).astype(o_ref.dtype)
        o_ref[...] = out2d[None, None, :, :]


def flash_attention(q, k, v, *, tile_q=128, tile_k=128):
    """q: (B, H, N, D), k/v: (B, H, M, D) -> (B, H, N, D). q pre-scaled."""
    B, H, N, D = q.shape
    Mkv = k.shape[2]
    tq = _pick_tile(N, tile_q)
    tk = _pick_tile(Mkv, tile_k)
    return pl.pallas_call(
        _flash_kernel,
        out_shape=jax.ShapeDtypeStruct((B, H, N, D), q.dtype),
        grid=(B, H, N // tq, Mkv // tk),
        in_specs=[
            pl.BlockSpec((1, 1, tq, D), lambda b, h, qi, ki: (b, h, qi, 0)),
            pl.BlockSpec((1, 1, tk, D), lambda b, h, qi, ki: (b, h, ki, 0)),
            pl.BlockSpec((1, 1, tk, D), lambda b, h, qi, ki: (b, h, ki, 0)),
        ],
        out_specs=pl.BlockSpec((1, 1, tq, D), lambda b, h, qi, ki: (b, h, qi, 0)),
        scratch_shapes=[
            pltpu.VMEM((tq, 1), jnp.float32),   # m (running max)
            pltpu.VMEM((tq, 1), jnp.float32),   # l (running sum)
            pltpu.VMEM((tq, D), jnp.float32),   # acc
        ],
        compiler_params=pltpu.CompilerParams(
            dimension_semantics=("parallel", "parallel", "parallel", "arbitrary"),
            vmem_limit_bytes=_VMEM_LIMIT,
        ),
    )(q, k, v)


# -------------- output projection fused with head-merge (lane-dense) ---------
def _proj_kernel(o_ref, w_ref, b_ref, y_ref, acc_sc):
    h = pl.program_id(2)

    @pl.when(h == 0)
    def _():
        acc_sc[...] = jnp.zeros_like(acc_sc)

    o_blk = o_ref[...][0, 0]          # (TN, D) for head h
    w_blk = w_ref[...][0]             # (D, C) slice of the proj weight
    acc_sc[...] += jnp.dot(o_blk, w_blk, preferred_element_type=jnp.float32)

    @pl.when(h == pl.num_programs(2) - 1)
    def _():
        y_ref[...] = (acc_sc[...] + b_ref[...]).astype(y_ref.dtype)[None]


def merge_heads_proj(o, w_hdc, b, *, tile_n=256):
    """o: (B, H, N, D), w_hdc: (H, D, C), b: (C,) -> (B, N, C) lane-dense."""
    B, H, N, D = o.shape
    C = w_hdc.shape[2]
    tn = _pick_tile(N, tile_n)
    b2d = b.reshape(1, C)
    return pl.pallas_call(
        _proj_kernel,
        out_shape=jax.ShapeDtypeStruct((B, N, C), o.dtype),
        grid=(B, N // tn, H),
        in_specs=[
            pl.BlockSpec((1, 1, tn, D), lambda bb, ni, h: (bb, h, ni, 0)),
            pl.BlockSpec((1, D, C), lambda bb, ni, h: (h, 0, 0)),
            pl.BlockSpec((1, C), lambda bb, ni, h: (0, 0)),
        ],
        out_specs=pl.BlockSpec((1, tn, C), lambda bb, ni, h: (bb, ni, 0)),
        scratch_shapes=[pltpu.VMEM((tn, C), jnp.float32)],
        compiler_params=pltpu.CompilerParams(
            dimension_semantics=("parallel", "parallel", "arbitrary"),
            vmem_limit_bytes=_VMEM_LIMIT,
        ),
    )(o, w_hdc, b2d)


# --------------------------- parameter preparation ----------------------------
def prepare_params(params, num_heads, dim):
    """One-time wrapper-side prep: transpose weights, fuse QKV, fold the scale."""
    D = dim // num_heads
    scale = D ** (-0.5)                       # qk_scale=None default
    wq_t_s = params["wq"].T * scale           # fold scale into q projection
    bq_s = params["bq"] * scale
    return {
        "wqkv_t": jnp.concatenate([wq_t_s, params["wk"].T, params["wv"].T], axis=1),
        "bqkv": jnp.concatenate([bq_s, params["bk"], params["bv"]], axis=0),
        "wq_t": wq_t_s,
        "bq": bq_s,
        "wkv_t": jnp.concatenate([params["wk"].T, params["wv"].T], axis=1),
        "bkv": jnp.concatenate([params["bk"], params["bv"]], axis=0),
        "wp_hdc": params["wp"].T.reshape(num_heads, D, dim),
        "bp": params["bp"],
    }


# ------------------------------ full forward ----------------------------------
def attention_forward(x, prepared, num_heads, context=None):
    B, N, C = x.shape
    D = C // num_heads

    if context is None:
        # Fused QKV projection: one kernel, x read once, (B*N, 3C) lane-dense out.
        qkv = linear_fused(x.reshape(B * N, C), prepared["wqkv_t"], prepared["bqkv"])
        qkv = qkv.reshape(B, N, 3, num_heads, D)
        qkv = jnp.transpose(qkv, (2, 0, 3, 1, 4))      # one packed transpose
        q, k, v = qkv[0], qkv[1], qkv[2]               # each (B, H, N, D)
    else:
        Bc, M, Cc = context.shape
        assert Bc == B, "cross-attention requires matching batch size"
        q = linear_fused(x.reshape(B * N, C), prepared["wq_t"], prepared["bq"])
        q = q.reshape(B, N, num_heads, D).transpose(0, 2, 1, 3)
        kv = linear_fused(context.reshape(B * M, Cc), prepared["wkv_t"], prepared["bkv"])
        kv = kv.reshape(B, M, 2, num_heads, D).transpose(2, 0, 3, 1, 4)
        k, v = kv[0], kv[1]

    o = flash_attention(q, k, v)                       # (B, H, N, D)
    # Head-merge fused into the projection; output is lane-dense (B, N, C).
    return merge_heads_proj(o, prepared["wp_hdc"], prepared["bp"])


# ------------------------------ reference (JAX) --------------------------------
def attention_reference(x, params, num_heads, context=None):
    B, N, C = x.shape
    kv = x if context is None else context
    M = kv.shape[1]
    D = C // num_heads
    scale = D ** (-0.5)
    q = x @ params["wq"].T + params["bq"]
    k = kv @ params["wk"].T + params["bk"]
    v = kv @ params["wv"].T + params["bv"]
    q = q.reshape(B, N, num_heads, D).transpose(0, 2, 1, 3)
    k = k.reshape(B, M, num_heads, D).transpose(0, 2, 1, 3)
    v = v.reshape(B, M, num_heads, D).transpose(0, 2, 1, 3)
    attn = jnp.einsum("bhnd,bhmd->bhnm", q, k) * scale
    attn = jax.nn.softmax(attn, axis=-1)
    o = jnp.einsum("bhnm,bhmd->bhnd", attn, v)
    o = o.transpose(0, 2, 1, 3).reshape(B, N, C)
    return o @ params["wp"].T + params["bp"]


if __name__ == "__main__":
    B, N, C, H = 2, 8, 32, 8   # dim=32, num_heads=8 -> head_dim=4

    key = jax.random.PRNGKey(0)
    kx, kq, kk, kv_, kp, kb, kc = jax.random.split(key, 7)

    x = jax.random.normal(kx, (B, N, C), dtype=jnp.float32)

    params = {
        # qkv_bias=False -> zero biases for q/k/v (numerically identical to no bias)
        "wq": jax.random.normal(kq, (C, C), dtype=jnp.float32) * 0.05,
        "bq": jnp.zeros((C,), dtype=jnp.float32),
        "wk": jax.random.normal(kk, (C, C), dtype=jnp.float32) * 0.05,
        "bk": jnp.zeros((C,), dtype=jnp.float32),
        "wv": jax.random.normal(kv_, (C, C), dtype=jnp.float32) * 0.05,
        "bv": jnp.zeros((C,), dtype=jnp.float32),
        # proj has bias
        "wp": jax.random.normal(kp, (C, C), dtype=jnp.float32) * 0.05,
        "bp": jax.random.normal(kb, (C,), dtype=jnp.float32) * 0.05,
    }

    prepared = prepare_params(params, H, C)

    # Self-attention path (fused QKV).
    out = jax.block_until_ready(attention_forward(x, prepared, H))
    ref = attention_reference(x, params, H)
    assert out.shape == (B, N, C)
    assert jnp.allclose(out, ref, atol=2e-3, rtol=2e-3), (
        f"self-attn max abs err = {jnp.max(jnp.abs(out - ref))}"
    )

    # Cross-attention path (separate Q and fused KV projections).
    ctx = jax.random.normal(kc, (B, 16, C), dtype=jnp.float32)
    out_x = jax.block_until_ready(attention_forward(x, prepared, H, context=ctx))
    ref_x = attention_reference(x, params, H, context=ctx)
    assert out_x.shape == (B, N, C)
    assert jnp.allclose(out_x, ref_x, atol=2e-3, rtol=2e-3), (
        f"cross-attn max abs err = {jnp.max(jnp.abs(out_x - ref_x))}"
    )

    print("KERNEL_OK")
</pallas_src>

<mosaic_0001>
module attributes {stable_mosaic.version = 11 : i64} {
  func.func @_matmul_bias_kernel(%arg0: i32, %arg1: memref<16x32xf32, #tpu.memory_space<vmem>>, %arg2: memref<32x96xf32, #tpu.memory_space<vmem>>, %arg3: memref<1x96xf32, #tpu.memory_space<vmem>>, %arg4: memref<16x96xf32, #tpu.memory_space<vmem>>) attributes {dimension_semantics = [#tpu.dimension_semantics<parallel>], iteration_bounds = array<i64: 1>, scalar_prefetch = 0 : i64, scratch_operands = 0 : i64, tpu.core_type = #tpu.core_type<tc>, window_params = [{transform_indices = @transform_0, window_bounds = array<i64: 16, 32>}, {pipeline_mode = #tpu.pipeline_mode<synchronous>, transform_indices = @transform_1, window_bounds = array<i64: 32, 96>}, {pipeline_mode = #tpu.pipeline_mode<synchronous>, transform_indices = @transform_2, window_bounds = array<i64: 1, 96>}, {transform_indices = @transform_3, window_bounds = array<i64: 16, 96>}]} {
    %c0 = arith.constant 0 : index
    %c0_0 = arith.constant 0 : index
    %0 = vector.load %arg1[%c0, %c0_0] : memref<16x32xf32, #tpu.memory_space<vmem>>, vector<16x32xf32>
    %c0_1 = arith.constant 0 : index
    %c0_2 = arith.constant 0 : index
    %1 = vector.load %arg2[%c0_1, %c0_2] : memref<32x96xf32, #tpu.memory_space<vmem>>, vector<32x96xf32>
    %cst = arith.constant dense<0.000000e+00> : vector<16x96xf32>
    %2 = tpu.matmul %0, %1, %cst {dimension_numbers = #tpu.dot_dimension_numbers<[1], [0], [0], [1], [0, 0, 1, 1], [], []>} : vector<16x32xf32>, vector<32x96xf32>, vector<16x96xf32> -> vector<16x96xf32>
    %c0_3 = arith.constant 0 : index
    %c0_4 = arith.constant 0 : index
    %3 = vector.load %arg3[%c0_3, %c0_4] : memref<1x96xf32, #tpu.memory_space<vmem>>, vector<1x96xf32>
    %4 = vector.broadcast %3 : vector<1x96xf32> to vector<16x96xf32>
    %5 = arith.addf %2, %4 : vector<16x96xf32>
    %c0_5 = arith.constant 0 : index
    %c0_6 = arith.constant 0 : index
    %6 = vector.load %arg4[%c0_5, %c0_6] : memref<16x96xf32, #tpu.memory_space<vmem>>, vector<16x96xf32>
    tpu.vector_store %arg4[%c0_5, %c0_6], %5 {strides = array<i32>} : memref<16x96xf32, #tpu.memory_space<vmem>>, vector<16x96xf32>,
    return
  }
  func.func @transform_0(%arg0: i32) -> (i32, i32) {
    %c0_i32 = arith.constant 0 : i32
    %c0_i32_0 = arith.constant 0 : i32
    return %arg0, %c0_i32 : i32, i32
  }
  func.func @transform_1(%arg0: i32) -> (i32, i32) {
    %c0_i32 = arith.constant 0 : i32
    %c0_i32_0 = arith.constant 0 : i32
    %c0_i32_1 = arith.constant 0 : i32
    return %c0_i32, %c0_i32_0 : i32, i32
  }
  func.func @transform_2(%arg0: i32) -> (i32, i32) {
    %c0_i32 = arith.constant 0 : i32
    %c0_i32_0 = arith.constant 0 : i32
    %c0_i32_1 = arith.constant 0 : i32
    return %c0_i32, %c0_i32_0 : i32, i32
  }
  func.func @transform_3(%arg0: i32) -> (i32, i32) {
    %c0_i32 = arith.constant 0 : i32
    %c0_i32_0 = arith.constant 0 : i32
    return %arg0, %c0_i32 : i32, i32
  }
}

</mosaic_0001>

<bundles_post_ra>
// kernel: tpu_custom_call.1
= control target key start
LH: loop header
LB: loop body
LE: loop exit
PB: predicated region body
PF: predicated region fallthrough
CT: control target
= control target key end

     0   :  { %8 = vsyncpa [#allocation3], 0  ;;  %s246_s0 = inlined_call_operand.hbm [shape: f32[16,32], index: 0, kind: input, shape index: {}]   ;;  %s247_s1 = inlined_call_operand.hbm [shape: f32[32,96], index: 1, kind: input, shape index: {}]   ;;  %s248_s2 = inlined_call_operand.vmem [shape: f32[1,96], index: 2, kind: input, shape index: {}]   ;;  %s249_s3 = inlined_call_operand.hbm [shape: f32[16,96], index: 3, kind: output, shape index: {}]  }
   0x1   :  { %9 = vsyncpa [#allocation6], 0 }
   0x2   :  { %10 = vsyncpa [#allocation4], 0  ;;  %s15_s14 = sshll.u32 %s246_s0, 4  ;;  %s200_s15 = smov [#allocation2]   ;;  %s16_s14 = int_to_ptr.hbm [resolvable:$true] %s15_s14 }
   0x3   :  { %s17_s16 = sshll.u32 %s200_s15, 4  ;;  %s28_s19 = sshll.u32 %s247_s1, 4  ;;  %s18_s16 = int_to_ptr.vmem [resolvable:$true] %s17_s16  ;;  %s29_s19 = int_to_ptr.hbm [resolvable:$true] %s28_s19 }
   0x4   :  { %s201_s20 = smov 128   ;;  %s202_s21 = smov 8  }
   0x5   :  { %23 = dma.hbm_to_vmem [thread:$0]  %s16_s14, 256, %s18_s16, [#allocation3], %s201_s20, %s201_s20, %s202_s21  }
   0x6   :  { %s203_s22 = smov [#allocation5]  }
   0x7   :  { %s30_s23 = sshll.u32 %s203_s22, 4  ;;  %s31_s23 = int_to_ptr.vmem [resolvable:$true] %s30_s23 }
   0x8   :  { %36 = dma.hbm_to_vmem [thread:$0]  %s29_s19, 512, %s31_s23, [#allocation6], %s201_s20, %s201_s20, %s202_s21  }
   0x9   :  { %194 = dma.done.wait [#allocation3], 256  }
   0xa   :  { %195 = vsyncadd [#allocation3], 4294967040 }
   0xb   :  { %196 = dma.done.wait [#allocation6], 512  }
   0xc   :  { %197 = vsyncadd [#allocation6], 4294966784  ;;  %v52_v0 = vld [vmem:[#allocation5 + $0x18] sm:$0xff]  ;;  %v51_v1 = vld [vmem:[#allocation5 + $0x10] sm:$0xff]  ;;  %vm57_vm0 = vcmask 261120   ;;  %s204_s24 = smov [#allocation7]  }
   0xd   :  { %76 = vmatpush.msra.mxu0 %v52_v0  ;;  %112 = vmatpush.msra.mxu1 %v52_v0  ;;  %v50_v2 = vld [vmem:[#allocation5 + $0x8] sm:$0xff]  ;;  %v49_v3 = vld [vmem:[#allocation5] sm:$0xff]  ;;  %v47_v4 = vld [vmem:[#allocation2] sm:$0xff]  ;;  %s94_s25 = sshll.u32 %s204_s24, 4  ;;  %s96_s28 = sshll.u32 %s249_s3, 4  ;;  %vm87_vm1 = vcmask 785408   ;;  %s95_s25 = int_to_ptr.vmem [resolvable:$true] %s94_s25  ;;  %s97_s28 = int_to_ptr.hbm [resolvable:$true] %s96_s28 }
   0xe   :  { %v48_v5 = vld [vmem:[#allocation2 + $0x8] sm:$0xff]  ;;  %v121_v6 = vld [vmem:[%s248_s2] ss:$0 sm:$0xff] }
   0xf   :  { %77 = vmatpush.msra.mxu0 %v51_v1  ;;  %113 = vmatpush.msra.mxu1 %v51_v1 }
  0x11   :  { %78 = vmatpush.msra.mxu0 %v50_v2  ;;  %114 = vmatpush.msra.mxu1 %v50_v2 }
  0x13   :  { %79 = vmatpush.msra.mxu0 %v49_v3  ;;  %115 = vmatpush.msra.mxu1 %v49_v3 }
  0x14   :  { %110 = vmatmul.msk.f32.vlgmr.msra.gmra.mxu0 %vm57_vm0, %v47_v4  ;;  %111 = vmatmul.msk.f32.vlgmr.msra.gmra.mxu1 %vm57_vm0, %v48_v5 }
  0x91   :  { %v81_v7 = vpop.f32.mrf.mxu0  ;;  %v84_v8 = vpop.f32.mrf.mxu1 }
  0x92   :  { %v82_v9 = vadd.f32 %v121_v6, %v81_v7  ;;  %v85_v10 = vadd.f32 %v121_v6, %v84_v8 }
  0x94   :  { %88 = vst.msk [vmem:[#allocation7] sm:$0xff] %vm87_vm1, %v82_v9 }
  0x95   :  { %89 = vst.msk [vmem:[#allocation7 + $0x8] sm:$0xff] %vm87_vm1, %v85_v10 }
  0x96   :  { %102 = dma.vmem_to_hbm [thread:$0]  %s95_s25, 256, %s97_s28, [#allocation4], %s201_s20, %s201_s20, %s202_s21  }
  0x97   :  { %198 = dma.done.wait [#allocation4], 256  }
  0x98   :  { %199 = vsyncadd [#allocation4], 4294967040 }
  0x99   :  { %107 = vsyncpa [#allocation3], 1 }
  0x9a   :  { %108 = vsyncpa [#allocation6], 1 }
  0x9b   :  { %109 = vsyncpa [#allocation4], 1 }

</bundles_post_ra>
